<compile_context>
chip_gen: v7x
topology: tpu7x:2x2x1
jax: 0.10.0
libtpu: 0.0.40
codegen_flags: <defaults>
</compile_context>

<pallas_src>
import math

import jax
import jax.numpy as jnp
from jax.experimental import pallas as pl
from jax.experimental.pallas import tpu as pltpu


# ----------------------------------------------------------------------------
# Kernel.  Refs:
#   cond (b, in) | w1e (in, L) | b1e (1, L) | w2e (in, L) | b2e (1, L)
#   x    (b, R, L)  ->  out (b, R, L)
# w*e / b*e are the fc weights pre-tiled to the lane period L (L % filters == 0),
# so the dot yields gamma/beta already in the torch-repeat lane pattern.
# ----------------------------------------------------------------------------
def _film_kernel(cond_ref, w1_ref, b1_ref, w2_ref, b2_ref, x_ref, o_ref):
    cond = cond_ref[...]
    gamma = jnp.dot(cond, w1_ref[...],
                    preferred_element_type=jnp.float32) + b1_ref[...]   # (b, L)
    beta = jnp.dot(cond, w2_ref[...],
                   preferred_element_type=jnp.float32) + b2_ref[...]    # (b, L)
    x = x_ref[...].astype(jnp.float32)                                  # (b, R, L)
    o_ref[...] = (gamma[:, None, :] * x + beta[:, None, :]).astype(o_ref.dtype)


def film_forward(cond, input_tensor, w1, b1, w2, b2,
                 *, vmem_tile_budget_bytes=20 * 1024 * 1024):
    b, in_features = cond.shape
    filters = w1.shape[0]
    _, c, h, w = input_tensor.shape
    assert c == filters, "input channels must equal `filters`"
    chw = c * h * w

    # Lane period L: multiple of `filters` (same repeat pattern on every row) and
    # of 128 (lane-dense stores) whenever chw allows; otherwise one full row.
    step = (c * 128) // math.gcd(c, 128)          # lcm(filters, 128)
    L = step if chw % step == 0 else chw
    # TODO(synk): for very large chw not divisible by lcm(filters,128) the tiled
    # weights below get wide; a masked 2-D path would be preferable there.
    nrows = chw // L
    reps = L // c

    f32 = jnp.float32
    w1e = jnp.tile(w1.T.astype(f32), (1, reps))           # (in, L)
    w2e = jnp.tile(w2.T.astype(f32), (1, reps))           # (in, L)
    b1e = jnp.tile(b1.astype(f32), (reps,)).reshape(1, L)  # (1, L)
    b2e = jnp.tile(b2.astype(f32), (reps,)).reshape(1, L)  # (1, L)

    x3 = input_tensor.reshape(b, nrows, L)                 # free reshape, native dtype
    itemsize = x3.dtype.itemsize

    # Rows per tile: x-in + out, each double-buffered -> 4 * b * R * L * itemsize.
    rows = max(1, vmem_tile_budget_bytes // (4 * b * L * itemsize))
    if rows >= nrows:
        rows = nrows                                       # full extent (exempt from 8-mult)
    else:
        rows = min(nrows, max(8, (rows // 8) * 8))         # sublane-aligned blocks
    grid = (pl.cdiv(nrows, rows),)

    cost = pl.CostEstimate(
        flops=int(2 * b * chw + grid[0] * 4 * b * in_features * L),
        transcendentals=0,
        bytes_accessed=int(2 * b * chw * itemsize
                           + 2 * in_features * L * 4 + 2 * L * 4
                           + b * in_features * 4),
    )

    resident = lambda r: (0, 0)                            # params DMA'd once, stay in VMEM
    out3 = pl.pallas_call(
        _film_kernel,
        out_shape=jax.ShapeDtypeStruct((b, nrows, L), input_tensor.dtype),
        grid=grid,
        in_specs=[
            pl.BlockSpec((b, in_features), resident),      # cond
            pl.BlockSpec((in_features, L), resident),      # W1.T tiled to period L
            pl.BlockSpec((1, L), resident),                # b1 tiled
            pl.BlockSpec((in_features, L), resident),      # W2.T tiled
            pl.BlockSpec((1, L), resident),                # b2 tiled
            pl.BlockSpec((b, rows, L), lambda r: (0, r, 0)),  # x tile (lane-dense)
        ],
        out_specs=pl.BlockSpec((b, rows, L), lambda r: (0, r, 0)),
        compiler_params=pltpu.CompilerParams(
            # No state carried across grid steps -> safe to shard across
            # TensorCores (v7x megacore); no-op on single-TC v5e/v6e.
            dimension_semantics=("parallel",),
            vmem_limit_bytes=32 * 1024 * 1024,
        ),
        cost_estimate=cost,
    )(cond.astype(f32), w1e, b1e, w2e, b2e, x3)

    return out3.reshape(b, c, h, w)


def _reference_forward(cond, input_tensor, w1, b1, w2, b2):
    """Pure-JAX replica of the PyTorch forward (for correctness checking)."""
    b, _ = cond.shape
    _, c, h, w = input_tensor.shape
    gamma = cond @ w1.T + b1
    beta = cond @ w2.T + b2
    gamma_rep = jnp.tile(gamma, (1, h * w)).reshape(b, c, h, w)
    beta_rep = jnp.tile(beta, (1, h * w)).reshape(b, c, h, w)
    return gamma_rep * input_tensor + beta_rep


if __name__ == "__main__":
    # Small shapes consistent with the module.
    B, IN_FEATURES, FILTERS, H, W = 2, 32, 4, 16, 16

    key = jax.random.PRNGKey(0)
    k_cond, k_x, k_w1, k_b1, k_w2, k_b2 = jax.random.split(key, 6)

    cond = jax.random.normal(k_cond, (B, IN_FEATURES), dtype=jnp.float32)
    input_tensor = jax.random.normal(k_x, (B, FILTERS, H, W), dtype=jnp.float32)

    # nn.Linear-style parameters: W (out, in), b (out,).
    bound = 1.0 / jnp.sqrt(IN_FEATURES)
    w1 = jax.random.uniform(k_w1, (FILTERS, IN_FEATURES), jnp.float32, -bound, bound)
    b1 = jax.random.uniform(k_b1, (FILTERS,), jnp.float32, -bound, bound)
    w2 = jax.random.uniform(k_w2, (FILTERS, IN_FEATURES), jnp.float32, -bound, bound)
    b2 = jax.random.uniform(k_b2, (FILTERS,), jnp.float32, -bound, bound)

    out = film_forward(cond, input_tensor, w1, b1, w2, b2)
    out = jax.block_until_ready(out)

    ref = _reference_forward(cond, input_tensor, w1, b1, w2, b2)
    assert out.shape == (B, FILTERS, H, W)
    assert jnp.allclose(out, ref, atol=1e-4, rtol=1e-4), "mismatch vs reference"

    print("KERNEL_OK")
</pallas_src>

<mosaic_0001>
module attributes {stable_mosaic.version = 11 : i64} {
  func.func @_film_kernel(%arg0: i32, %arg1: memref<2x32xf32, #tpu.memory_space<vmem>>, %arg2: memref<32x128xf32, #tpu.memory_space<vmem>>, %arg3: memref<1x128xf32, #tpu.memory_space<vmem>>, %arg4: memref<32x128xf32, #tpu.memory_space<vmem>>, %arg5: memref<1x128xf32, #tpu.memory_space<vmem>>, %arg6: memref<2x8x128xf32, #tpu.memory_space<vmem>>, %arg7: memref<2x8x128xf32, #tpu.memory_space<vmem>>) attributes {dimension_semantics = [#tpu.dimension_semantics<parallel>], iteration_bounds = array<i64: 1>, scalar_prefetch = 0 : i64, scratch_operands = 0 : i64, tpu.core_type = #tpu.core_type<tc>, window_params = [{pipeline_mode = #tpu.pipeline_mode<synchronous>, transform_indices = @transform_0, window_bounds = array<i64: 2, 32>}, {pipeline_mode = #tpu.pipeline_mode<synchronous>, transform_indices = @transform_1, window_bounds = array<i64: 32, 128>}, {pipeline_mode = #tpu.pipeline_mode<synchronous>, transform_indices = @transform_2, window_bounds = array<i64: 1, 128>}, {pipeline_mode = #tpu.pipeline_mode<synchronous>, transform_indices = @transform_3, window_bounds = array<i64: 32, 128>}, {pipeline_mode = #tpu.pipeline_mode<synchronous>, transform_indices = @transform_4, window_bounds = array<i64: 1, 128>}, {transform_indices = @transform_5, window_bounds = array<i64: 2, 8, 128>}, {transform_indices = @transform_6, window_bounds = array<i64: 2, 8, 128>}]} {
    %c0 = arith.constant 0 : index
    %c0_0 = arith.constant 0 : index
    %0 = vector.load %arg1[%c0, %c0_0] : memref<2x32xf32, #tpu.memory_space<vmem>>, vector<2x32xf32>
    %c0_1 = arith.constant 0 : index
    %c0_2 = arith.constant 0 : index
    %1 = vector.load %arg2[%c0_1, %c0_2] : memref<32x128xf32, #tpu.memory_space<vmem>>, vector<32x128xf32>
    %cst = arith.constant dense<0.000000e+00> : vector<2x128xf32>
    %2 = tpu.matmul %0, %1, %cst {dimension_numbers = #tpu.dot_dimension_numbers<[1], [0], [0], [1], [0, 0, 1, 1], [], []>} : vector<2x32xf32>, vector<32x128xf32>, vector<2x128xf32> -> vector<2x128xf32>
    %c0_3 = arith.constant 0 : index
    %c0_4 = arith.constant 0 : index
    %3 = vector.load %arg3[%c0_3, %c0_4] : memref<1x128xf32, #tpu.memory_space<vmem>>, vector<1x128xf32>
    %4 = vector.broadcast %3 : vector<1x128xf32> to vector<2x128xf32>
    %5 = arith.addf %2, %4 : vector<2x128xf32>
    %c0_5 = arith.constant 0 : index
    %c0_6 = arith.constant 0 : index
    %6 = vector.load %arg4[%c0_5, %c0_6] : memref<32x128xf32, #tpu.memory_space<vmem>>, vector<32x128xf32>
    %cst_7 = arith.constant dense<0.000000e+00> : vector<2x128xf32>
    %7 = tpu.matmul %0, %6, %cst_7 {dimension_numbers = #tpu.dot_dimension_numbers<[1], [0], [0], [1], [0, 0, 1, 1], [], []>} : vector<2x32xf32>, vector<32x128xf32>, vector<2x128xf32> -> vector<2x128xf32>
    %c0_8 = arith.constant 0 : index
    %c0_9 = arith.constant 0 : index
    %8 = vector.load %arg5[%c0_8, %c0_9] : memref<1x128xf32, #tpu.memory_space<vmem>>, vector<1x128xf32>
    %9 = vector.broadcast %8 : vector<1x128xf32> to vector<2x128xf32>
    %10 = arith.addf %7, %9 : vector<2x128xf32>
    %c0_10 = arith.constant 0 : index
    %c0_11 = arith.constant 0 : index
    %c0_12 = arith.constant 0 : index
    %11 = vector.load %arg6[%c0_10, %c0_11, %c0_12] : memref<2x8x128xf32, #tpu.memory_space<vmem>>, vector<2x8x128xf32>
    %12 = vector.shape_cast %5 : vector<2x128xf32> to vector<2x1x128xf32>
    %13 = vector.broadcast %12 : vector<2x1x128xf32> to vector<2x8x128xf32>
    %14 = arith.mulf %13, %11 : vector<2x8x128xf32>
    %15 = vector.shape_cast %10 : vector<2x128xf32> to vector<2x1x128xf32>
    %16 = vector.broadcast %15 : vector<2x1x128xf32> to vector<2x8x128xf32>
    %17 = arith.addf %14, %16 : vector<2x8x128xf32>
    %c0_13 = arith.constant 0 : index
    %c0_14 = arith.constant 0 : index
    %c0_15 = arith.constant 0 : index
    %18 = vector.load %arg7[%c0_13, %c0_14, %c0_15] : memref<2x8x128xf32, #tpu.memory_space<vmem>>, vector<2x8x128xf32>
    tpu.vector_store %arg7[%c0_13, %c0_14, %c0_15], %17 {strides = array<i32>} : memref<2x8x128xf32, #tpu.memory_space<vmem>>, vector<2x8x128xf32>,
    return
  }
  func.func @transform_0(%arg0: i32) -> (i32, i32) {
    %c0_i32 = arith.constant 0 : i32
    %c0_i32_0 = arith.constant 0 : i32
    %c0_i32_1 = arith.constant 0 : i32
    return %c0_i32, %c0_i32_0 : i32, i32
  }
  func.func @transform_1(%arg0: i32) -> (i32, i32) {
    %c0_i32 = arith.constant 0 : i32
    %c0_i32_0 = arith.constant 0 : i32
    %c0_i32_1 = arith.constant 0 : i32
    return %c0_i32, %c0_i32_0 : i32, i32
  }
  func.func @transform_2(%arg0: i32) -> (i32, i32) {
    %c0_i32 = arith.constant 0 : i32
    %c0_i32_0 = arith.constant 0 : i32
    %c0_i32_1 = arith.constant 0 : i32
    return %c0_i32, %c0_i32_0 : i32, i32
  }
  func.func @transform_3(%arg0: i32) -> (i32, i32) {
    %c0_i32 = arith.constant 0 : i32
    %c0_i32_0 = arith.constant 0 : i32
    %c0_i32_1 = arith.constant 0 : i32
    return %c0_i32, %c0_i32_0 : i32, i32
  }
  func.func @transform_4(%arg0: i32) -> (i32, i32) {
    %c0_i32 = arith.constant 0 : i32
    %c0_i32_0 = arith.constant 0 : i32
    %c0_i32_1 = arith.constant 0 : i32
    return %c0_i32, %c0_i32_0 : i32, i32
  }
  func.func @transform_5(%arg0: i32) -> (i32, i32, i32) {
    %c0_i32 = arith.constant 0 : i32
    %c0_i32_0 = arith.constant 0 : i32
    %c0_i32_1 = arith.constant 0 : i32
    return %c0_i32, %arg0, %c0_i32_0 : i32, i32, i32
  }
  func.func @transform_6(%arg0: i32) -> (i32, i32, i32) {
    %c0_i32 = arith.constant 0 : i32
    %c0_i32_0 = arith.constant 0 : i32
    %c0_i32_1 = arith.constant 0 : i32
    return %c0_i32, %arg0, %c0_i32_0 : i32, i32, i32
  }
}

</mosaic_0001>

<bundles_post_ra>
// kernel: tpu_custom_call.1
= control target key start
LH: loop header
LB: loop body
LE: loop exit
PB: predicated region body
PF: predicated region fallthrough
CT: control target
= control target key end

     0   :  { %11 = vsyncpa [#allocation3], 0  ;;  %s588_s0 = inlined_call_operand.hbm [shape: f32[2,32], index: 0, kind: input, shape index: {}]   ;;  %s589_s1 = inlined_call_operand.hbm [shape: f32[32,128], index: 1, kind: input, shape index: {}]   ;;  %s590_s2 = inlined_call_operand.vmem [shape: f32[1,128], index: 2, kind: input, shape index: {}]   ;;  %s591_s3 = inlined_call_operand.hbm [shape: f32[32,128], index: 3, kind: input, shape index: {}]   ;;  %s592_s4 = inlined_call_operand.vmem [shape: f32[1,128], index: 4, kind: input, shape index: {}]   ;;  %s593_s5 = inlined_call_operand.vmem [shape: f32[2,8,128], index: 5, kind: input, shape index: {}]   ;;  %s594_s6 = inlined_call_operand.hbm [shape: f32[2,8,128], index: 6, kind: output, shape index: {}]  }
   0x1   :  { %12 = vsyncpa [#allocation6], 0 }
   0x2   :  { %13 = vsyncpa [#allocation4], 0  ;;  %s474_s21 = smov [#allocation5]   ;;  %s380_s25 = scalar_lea.hbm %s589_s1, 512 }
   0x3   :  { %s29_s22 = sshll.u32 %s474_s21, 4  ;;  %p381_p0 = scmp.ne.s32.totalorder %s589_s1, %s380_s25  ;;  %s30_s22 = int_to_ptr.vmem [resolvable:$true] %s29_s22 }
   0x4   :  { %p384_p1 = scmp.lt.u32.totalorder %s380_s25, %s589_s1 }
   0x6   :  { %p386_p2 = pnand %p384_p1, %p381_p0 }
   0x8   :  { %389 = shalt.err (!%p386_p2)
}
   0x9   :  { %s390_s30 = scalar_lea.vmem %s30_s22, 512  ;;  %p395_p4 = scmp.lt.s32.totalorder %s30_s22, %s30_s22 }
   0xa   :  { %p391_p3 = scmp.ne.s32.totalorder %s30_s22, %s390_s30  ;;  %p396_p5 = scmp.lt.s32.totalorder %s390_s30, %s390_s30 }
   0xc   :  { %p397_p6 = por %p396_p5, %p395_p4 }
   0xe   :  { %p398_p7 = pnand %p397_p6, %p391_p3 }
  0x10   :  { %401 = shalt.err (!%p398_p7)
}
  0x11   :  { %s475_s7 = smov 128   ;;  %s476_s8 = smov 8  }
  0x12   :  { %35 = dma.hbm_to_vmem [thread:$0]  %s589_s1, 512, %s30_s22, [#allocation6], %s475_s7, %s475_s7, %s476_s8  }
  0x13   :  { %s477_s11 = smov [#allocation2]   ;;  %s478_s13 = smov [#allocation7]  }
  0x14   :  { %s20_s12 = sshll.u32 %s477_s11, 4  ;;  %s43_s14 = sshll.u32 %s478_s13, 4  ;;  %s21_s12 = int_to_ptr.vmem [resolvable:$true] %s20_s12  ;;  %s44_s14 = int_to_ptr.vmem [resolvable:$true] %s43_s14 }
  0x15   :  { %s402_s17 = scalar_lea.hbm %s588_s0, 32 }
  0x16   :  { %p403_p8 = scmp.ne.s32.totalorder %s588_s0, %s402_s17  ;;  %p406_p9 = scmp.lt.u32.totalorder %s402_s17, %s588_s0 }
  0x18   :  { %p408_p10 = pnand %p406_p9, %p403_p8 }
  0x1a   :  { %411 = shalt.err (!%p408_p10)
}
  0x1b   :  { %s412_s1 = scalar_lea.vmem %s21_s12, 32  ;;  %p417_p12 = scmp.lt.s32.totalorder %s21_s12, %s21_s12 }
  0x1c   :  { %p413_p11 = scmp.ne.s32.totalorder %s21_s12, %s412_s1  ;;  %p418_p13 = scmp.lt.s32.totalorder %s412_s1, %s412_s1 }
  0x1e   :  { %p419_p0 = por %p418_p13, %p417_p12 }
  0x20   :  { %p420_p1 = pnand %p419_p0, %p413_p11 }
  0x22   :  { %423 = shalt.err (!%p420_p1)
}
  0x23   :  { %23 = dma.hbm_to_vmem [thread:$0]  %s588_s0, 32, %s21_s12, [#allocation3]  }
  0x24   :  { %s424_s26 = scalar_lea.hbm %s591_s3, 512 }
  0x25   :  { %p425_p2 = scmp.ne.s32.totalorder %s591_s3, %s424_s26  ;;  %p428_p3 = scmp.lt.u32.totalorder %s424_s26, %s591_s3 }
  0x27   :  { %p430_p4 = pnand %p428_p3, %p425_p2 }
  0x29   :  { %433 = shalt.err (!%p430_p4)
}
  0x2a   :  { %s434_s9 = scalar_lea.vmem %s44_s14, 512  ;;  %p439_p6 = scmp.lt.s32.totalorder %s44_s14, %s44_s14 }
  0x2b   :  { %p435_p5 = scmp.ne.s32.totalorder %s44_s14, %s434_s9  ;;  %p440_p7 = scmp.lt.s32.totalorder %s434_s9, %s434_s9 }
  0x2d   :  { %p441_p8 = por %p440_p7, %p439_p6 }
  0x2f   :  { %p442_p9 = pnand %p441_p8, %p435_p5 }
  0x31   :  { %445 = shalt.err (!%p442_p9)
}
  0x32   :  { %49 = dma.hbm_to_vmem [thread:$0]  %s591_s3, 512, %s44_s14, [#allocation6], %s475_s7, %s475_s7, %s476_s8  }
  0x33   :  { %468 = dma.done.wait [#allocation3], 32  }
  0x34   :  { %469 = vsyncadd [#allocation3], 4294967264 }
  0x35   :  { %470 = dma.done.wait [#allocation6], 1024  }
  0x36   :  { %471 = vsyncadd [#allocation6], 4294966272  ;;  %v479_v0 = vmov 0.0|0.0   ;;  %vm480_vm0 = vmmov 0   ;;  %v481_v1 = vmov 0.0   ;;  %v64_v2 = vld [vmem:[#allocation5] sm:$0xff]  ;;  %v236_v17 = vlaneseq }
  0x37   :  { %358 = vmatprep.subr.bf16.mxu0 %v479_v0  ;;  %364 = vmatprep.subr.bf16.mxu1 %v479_v0  ;;  %v65_v3 = vld [vmem:[#allocation5 + $0x8] sm:$0xff]  ;;  %v149_v4 = vld [vmem:[#allocation7] sm:$0xff]  ;;  %v66_v7 = vld [vmem:[#allocation5 + $0x10] sm:$0xff]  ;;  %vm75_vm1 = vcmask 261120   ;;  %v482_v15 = vmov 1966171168  }
  0x38   :  { %344 = vmatprep.mubr.msk.f32.mxu0 %vm480_vm0, %v481_v1  ;;  %355 = vmatprep.mubr.msk.f32.mxu1 %vm480_vm0, %v481_v1  ;;  %v359_v5 = vpack.c.bf16 %v65_v3, %v64_v2  ;;  %v150_v6 = vld [vmem:[#allocation7 + $0x8] sm:$0xff]  ;;  %v67_v8 = vld [vmem:[#allocation5 + $0x18] sm:$0xff]  ;;  %v151_v10 = vld [vmem:[#allocation7 + $0x10] sm:$0xff]  ;;  %v234_v16 = vunpack.c.l.s4 %v482_v15  ;;  %v237_v19 = vshrl.u32 %v236_v17, 7  ;;  %s483_s16 = smov [#allocation8]  }
  0x39   :  { %v365_v9 = vpack.c.bf16 %v150_v6, %v149_v4  ;;  %v152_v11 = vld [vmem:[#allocation7 + $0x18] sm:$0xff]  ;;  %v362_v12 = vpack.c.bf16 %v67_v8, %v66_v7  ;;  %v322_v20 = vld [vmem:[%s590_s2] ss:$0 sm:$0xff]  ;;  %s309_s17 = sshll.u32 %s483_s16, 4  ;;  %s310_s17 = int_to_ptr.vmem [resolvable:$true] %s309_s17 }
  0x3a   :  { %360 = vmatpush3.bf16.msra.mxu0 %v359_v5  ;;  %v368_v13 = vpack.c.bf16 %v152_v11, %v151_v10  ;;  %v63_v14 = vld [vmem:[#allocation2] sm:$0x3]  ;;  %v235_v18 = vunpack.c.0.s8 %v234_v16  ;;  %v324_v22 = vld [vmem:[%s592_s4] ss:$0 sm:$0xff]  ;;  %v257_v30 = vsub.s32 0, %v237_v19  ;;  %v231_v41 = vld [vmem:[%s593_s5 + $0x8] sm:$0xff]  ;;  %p451_p11 = scmp.lt.s32.totalorder %s310_s17, %s310_s17 }
  0x3b   :  { %366 = vmatpush3.bf16.msra.mxu1 %v365_v9  ;;  %361 = vmatprep.subr.bf16.mxu0 %v479_v0  ;;  %v230_v36 = vld [vmem:[%s593_s5] sm:$0xff]  ;;  %s446_s18 = scalar_lea.vmem %s310_s17, 256 }
  0x3c   :  { %367 = vmatprep.subr.bf16.mxu1 %v479_v0  ;;  %v238_v21 = vsub.s32 %v235_v18, %v237_v19  ;;  %p447_p10 = scmp.ne.s32.totalorder %s310_s17, %s446_s18  ;;  %p452_p12 = scmp.lt.s32.totalorder %s446_s18, %s446_s18 }
  0x3e   :  { %363 = vmatpush3.bf16.msra.mxu0 %v362_v12  ;;  %p453_p13 = por %p452_p12, %p451_p11 }
  0x3f   :  { %369 = vmatpush3.bf16.msra.mxu1 %v368_v13 }
  0x40   :  { %p454_p0 = pnand %p453_p13, %p447_p10 }
  0x41   :  { %345 = vmatmul.mubr.msk.f32.vlgmr.msra.gmra.mrb[0].mxu0 %vm75_vm1, %v63_v14 }
  0x42   :  { %356 = vmatmul.mubr.msk.f32.vlgmr.msra.gmra.mrb[0].mxu1 %vm75_vm1, %v63_v14 }
 0x114   :  { %v145_v23 = vpop.f32.mrb[0].mxu0 }
 0x115   :  { %v146_v24 = vadd.f32 %v322_v20, %v145_v23  ;;  %v346_v25 = vpop.f32.mrb[1].mxu0  ;;  %v226_v26 = vpop.f32.mrb[0].mxu1 }
 0x116   :  { %v227_v27 = vadd.f32 %v324_v22, %v226_v26  ;;  %v357_v28 = vpop.f32.mrb[1].mxu1 }
 0x117   :  { %v239_v29 = vrot.slane %v146_v24, %v238_v21 }
 0x118   :  { %v274_v31 = vrot.slane %v227_v27, %v238_v21 }
 0x119   :  { %v240_v32 = vcombine.high %v239_v29, %v239_v29  ;;  %v247_v33 = vrot.slane %v239_v29, %v238_v21 }
 0x11a   :  { %v275_v34 = vcombine.high %v274_v31, %v274_v31  ;;  %v282_v35 = vrot.slane %v274_v31, %v238_v21 }
 0x11b   :  { %v254_v37 = vrot.slane %v240_v32, %v238_v21  ;;  %v258_v38 = vrot.slane %v247_v33, %v257_v30 }
 0x11c   :  { %v289_v39 = vrot.slane %v275_v34, %v238_v21  ;;  %v293_v40 = vrot.slane %v282_v35, %v257_v30 }
 0x11d   :  { %v262_v42 = vrot.slane %v254_v37, %v257_v30  ;;  %v265_v43 = vmul.f32 %v258_v38, %v230_v36 }
 0x11e   :  { %v297_v44 = vrot.slane %v289_v39, %v257_v30 }
 0x11f   :  { %v266_v45 = vmul.f32 %v262_v42, %v231_v41  ;;  %v300_v46 = vadd.f32 %v293_v40, %v265_v43 }
 0x121   :  { %v301_v47 = vadd.f32 %v297_v44, %v266_v45  ;;  %302 = vst [vmem:[#allocation8] sm:$0xff] %v300_v46 }
 0x123   :  { %303 = vst [vmem:[#allocation8 + $0x8] sm:$0xff] %v301_v47 }
 0x124   :  { %457 = shalt.err (!%p454_p0)
}
 0x125   :  { %s458_s20 = scalar_lea.hbm %s594_s6, 256 }
 0x126   :  { %p459_p1 = scmp.ne.s32.totalorder %s594_s6, %s458_s20  ;;  %p462_p2 = scmp.lt.u32.totalorder %s458_s20, %s594_s6 }
 0x128   :  { %p464_p3 = pnand %p462_p2, %p459_p1 }
 0x12a   :  { %467 = shalt.err (!%p464_p3)
}
 0x12b   :  { %315 = dma.vmem_to_hbm [thread:$0]  %s310_s17, 256, %s594_s6, [#allocation4], %s475_s7, %s475_s7, %s476_s8  }
 0x12c   :  { %472 = dma.done.wait [#allocation4], 256  }
 0x12d   :  { %473 = vsyncadd [#allocation4], 4294967040 }
 0x12e   :  { %319 = vsyncpa [#allocation3], 1 }
 0x12f   :  { %320 = vsyncpa [#allocation6], 1 }
 0x130   :  { %321 = vsyncpa [#allocation4], 1 }

</bundles_post_ra>
